<compile_context>
chip_gen: v7x
topology: tpu7x:2x2x1
jax: 0.10.0
libtpu: 0.0.40
codegen_flags: <defaults>
</compile_context>

<pallas_src>
import math

import jax
import jax.numpy as jnp
from jax import lax
from jax.experimental import pallas as pl
from jax.experimental.pallas import tpu as pltpu

K_IN = 28 * 28          # 784 (fed unpadded; Mosaic masks the unaligned contraction)
H1 = 128
H2 = 64
N_OUT = 10
N_PAD = 128             # lane-dense output width (unmasked vst)
SUB = 256               # in-kernel row sub-tile (bounds f32 intermediate live ranges)


def _round_up(x, m):
    return ((x + m - 1) // m) * m


def fc_mlp_kernel(x_ref, w1_ref, b1_ref, w2_ref, b2_ref, w3_ref, b3_ref, o_ref):
    tm = o_ref.shape[0]
    # Static (trace-time) sub-tiling decision: big DMA tile, bounded compute tile.
    sub = SUB if (tm % SUB == 0 and tm > SUB) else tm
    n_sub = tm // sub

    def compute(row):
        # Cast activations to bf16 in-kernel (VPU op, hidden under the HBM DMA).
        x = x_ref[pl.ds(row, sub), :].astype(jnp.bfloat16)                 # (sub, 784)
        h1 = jnp.dot(x, w1_ref[...], preferred_element_type=jnp.float32) + b1_ref[...]
        h1 = jnp.maximum(h1, 0.0).astype(jnp.bfloat16)                     # (sub, 128)
        h2 = jnp.dot(h1, w2_ref[...], preferred_element_type=jnp.float32) + b2_ref[...]
        h2 = jnp.maximum(h2, 0.0).astype(jnp.bfloat16)                     # (sub, 64)
        out = jnp.dot(h2, w3_ref[...], preferred_element_type=jnp.float32) + b3_ref[...]
        o_ref[pl.ds(row, sub), :] = out.astype(o_ref.dtype)                # (sub, 128)

    if n_sub == 1:
        compute(0)
    else:
        def body(s, carry):
            compute(pl.multiple_of(s * sub, sub))
            return carry
        lax.fori_loop(0, n_sub, body, 0)


def _choose_tm(B):
    if B <= 16:
        return _round_up(B, 8)
    # Large tiles approach the HBM roofline; cap at 1024 rows and keep >= 2 grid
    # steps so the batch axis can shard across the 2 TensorCores on v7x megacore.
    return min(1024, _round_up(pl.cdiv(B, 2), 8))


def fc_forward(x_nchw, params, *, tm=None):
    """x_nchw: (B, 1, 28, 28) float32 -> logits (B, 10) float32."""
    w1, b1, w2, b2, w3, b3 = params
    B = x_nchw.shape[0]
    # torch x.view(-1, 784): pure metadata reshape, no HBM copy.
    x = x_nchw.reshape(B, K_IN).astype(jnp.float32)

    if tm is None:
        tm = _choose_tm(B)
    grid = (pl.cdiv(B, tm),)   # ragged last tile: OOB rows garbage-in, dropped on write

    # Weights: bf16 MXU inputs; only w3/b3 are N-padded (10 -> 128) for a lane-dense
    # output store. Zero padding is exact (padded columns contribute 0, sliced off).
    w1_b = w1.astype(jnp.bfloat16)
    w2_b = w2.astype(jnp.bfloat16)
    w3_p = jnp.zeros((H2, N_PAD), jnp.bfloat16).at[:, :N_OUT].set(w3.astype(jnp.bfloat16))
    b1_2d = b1.reshape(1, H1).astype(jnp.float32)
    b2_2d = b2.reshape(1, H2).astype(jnp.float32)
    b3_2d = jnp.zeros((1, N_PAD), jnp.float32).at[:, :N_OUT].set(b3.astype(jnp.float32))

    flops = 2 * B * (K_IN * H1 + H1 * H2 + H2 * N_PAD)
    bytes_accessed = (
        B * K_IN * 4                                   # x (f32, read once in-kernel)
        + (w1_b.size + w2_b.size + w3_p.size) * 2      # bf16 weights
        + (b1_2d.size + b2_2d.size + b3_2d.size) * 4   # f32 biases
        + B * N_PAD * 2                                # bf16 logits
    )

    out_padded = pl.pallas_call(
        fc_mlp_kernel,
        out_shape=jax.ShapeDtypeStruct((B, N_PAD), jnp.bfloat16),
        grid_spec=pltpu.PrefetchScalarGridSpec(
            num_scalar_prefetch=0,
            grid=grid,
            in_specs=[
                pl.BlockSpec((tm, K_IN), lambda i: (i, 0)),      # x tile (pipelined, f32)
                pl.BlockSpec((K_IN, H1), lambda i: (0, 0)),      # w1 (VMEM-resident)
                pl.BlockSpec((1, H1), lambda i: (0, 0)),         # b1
                pl.BlockSpec((H1, H2), lambda i: (0, 0)),        # w2
                pl.BlockSpec((1, H2), lambda i: (0, 0)),         # b2
                pl.BlockSpec((H2, N_PAD), lambda i: (0, 0)),     # w3 (N-padded)
                pl.BlockSpec((1, N_PAD), lambda i: (0, 0)),      # b3 (N-padded)
            ],
            out_specs=pl.BlockSpec((tm, N_PAD), lambda i: (i, 0)),
        ),
        compiler_params=pltpu.CompilerParams(
            dimension_semantics=("parallel",),          # batch axis -> megacore on v7x
            vmem_limit_bytes=32 * 1024 * 1024,          # headroom for tm=1024 tiles
        ),
        cost_estimate=pl.CostEstimate(
            flops=flops, transcendentals=0, bytes_accessed=bytes_accessed
        ),
    )(x, w1_b, b1_2d, w2_b, b2_2d, w3_p, b3_2d)

    # Slice the 10 real logit columns; restore caller-facing f32 dtype.
    return out_padded[:, :N_OUT].astype(jnp.float32)


def init_linear(key, fan_in, fan_out):
    # PyTorch nn.Linear default init: U(-1/sqrt(fan_in), 1/sqrt(fan_in)) for W and b.
    kw, kb = jax.random.split(key)
    bound = 1.0 / math.sqrt(fan_in)
    # Stored transposed relative to PyTorch: (in, out), so x @ W == torch x @ W.T.
    w = jax.random.uniform(kw, (fan_in, fan_out), jnp.float32, -bound, bound)
    b = jax.random.uniform(kb, (fan_out,), jnp.float32, -bound, bound)
    return w, b


def reference_forward(x_nchw, params):
    # Pure-JAX reference mirroring the kernel's mixed precision
    # (bf16 matmul inputs, f32 accumulation, f32 bias/ReLU, f32 logits).
    w1, b1, w2, b2, w3, b3 = params
    bf = jnp.bfloat16
    x = x_nchw.reshape(x_nchw.shape[0], K_IN)
    h1 = jnp.maximum(
        jnp.dot(x.astype(bf), w1.astype(bf), preferred_element_type=jnp.float32) + b1, 0.0)
    h2 = jnp.maximum(
        jnp.dot(h1.astype(bf), w2.astype(bf), preferred_element_type=jnp.float32) + b2, 0.0)
    return jnp.dot(h2.astype(bf), w3.astype(bf), preferred_element_type=jnp.float32) + b3


if __name__ == "__main__":
    key = jax.random.PRNGKey(0)
    k_x, k1, k2, k3 = jax.random.split(key, 4)

    B = 8  # small demo batch (wrapper scales to real batches via 256..1024-row tiles)
    x = jax.random.normal(k_x, (B, 1, 28, 28), jnp.float32)

    w1, b1 = init_linear(k1, K_IN, H1)
    w2, b2 = init_linear(k2, H1, H2)
    w3, b3 = init_linear(k3, H2, N_OUT)
    params = (w1, b1, w2, b2, w3, b3)

    out = fc_forward(x, params)
    out = jax.block_until_ready(out)

    ref = reference_forward(x, params)
    assert out.shape == (B, N_OUT)
    # Kernel logits are rounded through bf16 on the way out -> slightly looser tolerance.
    assert jnp.allclose(out, ref, atol=2e-2, rtol=2e-2), "mismatch vs JAX reference"

    print("KERNEL_OK")
</pallas_src>

<mosaic_0001>
module attributes {stable_mosaic.version = 11 : i64} {
  func.func @fc_mlp_kernel(%arg0: i32, %arg1: memref<8x784xf32, #tpu.memory_space<vmem>>, %arg2: memref<784x128xbf16, #tpu.memory_space<vmem>>, %arg3: memref<1x128xf32, #tpu.memory_space<vmem>>, %arg4: memref<128x64xbf16, #tpu.memory_space<vmem>>, %arg5: memref<1x64xf32, #tpu.memory_space<vmem>>, %arg6: memref<64x128xbf16, #tpu.memory_space<vmem>>, %arg7: memref<1x128xf32, #tpu.memory_space<vmem>>, %arg8: memref<8x128xbf16, #tpu.memory_space<vmem>>) attributes {dimension_semantics = [#tpu.dimension_semantics<parallel>], iteration_bounds = array<i64: 1>, scalar_prefetch = 0 : i64, scratch_operands = 0 : i64, tpu.core_type = #tpu.core_type<tc>, window_params = [{transform_indices = @transform_0, window_bounds = array<i64: 8, 784>}, {pipeline_mode = #tpu.pipeline_mode<synchronous>, transform_indices = @transform_1, window_bounds = array<i64: 784, 128>}, {pipeline_mode = #tpu.pipeline_mode<synchronous>, transform_indices = @transform_2, window_bounds = array<i64: 1, 128>}, {pipeline_mode = #tpu.pipeline_mode<synchronous>, transform_indices = @transform_3, window_bounds = array<i64: 128, 64>}, {pipeline_mode = #tpu.pipeline_mode<synchronous>, transform_indices = @transform_4, window_bounds = array<i64: 1, 64>}, {pipeline_mode = #tpu.pipeline_mode<synchronous>, transform_indices = @transform_5, window_bounds = array<i64: 64, 128>}, {pipeline_mode = #tpu.pipeline_mode<synchronous>, transform_indices = @transform_6, window_bounds = array<i64: 1, 128>}, {transform_indices = @transform_7, window_bounds = array<i64: 8, 128>}]} {
    %c0 = arith.constant 0 : index
    %c0_0 = arith.constant 0 : index
    %0 = vector.load %arg1[%c0, %c0_0] : memref<8x784xf32, #tpu.memory_space<vmem>>, vector<8x784xf32>
    %1 = arith.truncf %0 : vector<8x784xf32> to vector<8x784xbf16>
    %c0_1 = arith.constant 0 : index
    %c0_2 = arith.constant 0 : index
    %2 = vector.load %arg2[%c0_1, %c0_2] : memref<784x128xbf16, #tpu.memory_space<vmem>>, vector<784x128xbf16>
    %cst = arith.constant dense<0.000000e+00> : vector<8x128xf32>
    %3 = tpu.matmul %1, %2, %cst {dimension_numbers = #tpu.dot_dimension_numbers<[1], [0], [0], [1], [0, 0, 1, 1], [], []>} : vector<8x784xbf16>, vector<784x128xbf16>, vector<8x128xf32> -> vector<8x128xf32>
    %c0_3 = arith.constant 0 : index
    %c0_4 = arith.constant 0 : index
    %4 = vector.load %arg3[%c0_3, %c0_4] : memref<1x128xf32, #tpu.memory_space<vmem>>, vector<1x128xf32>
    %5 = vector.broadcast %4 : vector<1x128xf32> to vector<8x128xf32>
    %6 = arith.addf %3, %5 : vector<8x128xf32>
    %cst_5 = arith.constant 0.000000e+00 : f32
    %7 = vector.broadcast %cst_5 : f32 to vector<8x128xf32>
    %8 = arith.maximumf %6, %7 : vector<8x128xf32>
    %9 = arith.truncf %8 : vector<8x128xf32> to vector<8x128xbf16>
    %c0_6 = arith.constant 0 : index
    %c0_7 = arith.constant 0 : index
    %10 = vector.load %arg4[%c0_6, %c0_7] : memref<128x64xbf16, #tpu.memory_space<vmem>>, vector<128x64xbf16>
    %cst_8 = arith.constant dense<0.000000e+00> : vector<8x64xf32>
    %11 = tpu.matmul %9, %10, %cst_8 {dimension_numbers = #tpu.dot_dimension_numbers<[1], [0], [0], [1], [0, 0, 1, 1], [], []>} : vector<8x128xbf16>, vector<128x64xbf16>, vector<8x64xf32> -> vector<8x64xf32>
    %c0_9 = arith.constant 0 : index
    %c0_10 = arith.constant 0 : index
    %12 = vector.load %arg5[%c0_9, %c0_10] : memref<1x64xf32, #tpu.memory_space<vmem>>, vector<1x64xf32>
    %13 = vector.broadcast %12 : vector<1x64xf32> to vector<8x64xf32>
    %14 = arith.addf %11, %13 : vector<8x64xf32>
    %cst_11 = arith.constant 0.000000e+00 : f32
    %15 = vector.broadcast %cst_11 : f32 to vector<8x64xf32>
    %16 = arith.maximumf %14, %15 : vector<8x64xf32>
    %17 = arith.truncf %16 : vector<8x64xf32> to vector<8x64xbf16>
    %c0_12 = arith.constant 0 : index
    %c0_13 = arith.constant 0 : index
    %18 = vector.load %arg6[%c0_12, %c0_13] : memref<64x128xbf16, #tpu.memory_space<vmem>>, vector<64x128xbf16>
    %cst_14 = arith.constant dense<0.000000e+00> : vector<8x128xf32>
    %19 = tpu.matmul %17, %18, %cst_14 {dimension_numbers = #tpu.dot_dimension_numbers<[1], [0], [0], [1], [0, 0, 1, 1], [], []>} : vector<8x64xbf16>, vector<64x128xbf16>, vector<8x128xf32> -> vector<8x128xf32>
    %c0_15 = arith.constant 0 : index
    %c0_16 = arith.constant 0 : index
    %20 = vector.load %arg7[%c0_15, %c0_16] : memref<1x128xf32, #tpu.memory_space<vmem>>, vector<1x128xf32>
    %21 = vector.broadcast %20 : vector<1x128xf32> to vector<8x128xf32>
    %22 = arith.addf %19, %21 : vector<8x128xf32>
    %23 = arith.truncf %22 : vector<8x128xf32> to vector<8x128xbf16>
    %c0_17 = arith.constant 0 : index
    %c0_18 = arith.constant 0 : index
    %24 = vector.load %arg8[%c0_17, %c0_18] : memref<8x128xbf16, #tpu.memory_space<vmem>>, vector<8x128xbf16>
    tpu.vector_store %arg8[%c0_17, %c0_18], %23 {strides = array<i32>} : memref<8x128xbf16, #tpu.memory_space<vmem>>, vector<8x128xbf16>,
    return
  }
  func.func @transform_0(%arg0: i32) -> (i32, i32) {
    %c0_i32 = arith.constant 0 : i32
    %c0_i32_0 = arith.constant 0 : i32
    return %arg0, %c0_i32 : i32, i32
  }
  func.func @transform_1(%arg0: i32) -> (i32, i32) {
    %c0_i32 = arith.constant 0 : i32
    %c0_i32_0 = arith.constant 0 : i32
    %c0_i32_1 = arith.constant 0 : i32
    return %c0_i32, %c0_i32_0 : i32, i32
  }
  func.func @transform_2(%arg0: i32) -> (i32, i32) {
    %c0_i32 = arith.constant 0 : i32
    %c0_i32_0 = arith.constant 0 : i32
    %c0_i32_1 = arith.constant 0 : i32
    return %c0_i32, %c0_i32_0 : i32, i32
  }
  func.func @transform_3(%arg0: i32) -> (i32, i32) {
    %c0_i32 = arith.constant 0 : i32
    %c0_i32_0 = arith.constant 0 : i32
    %c0_i32_1 = arith.constant 0 : i32
    return %c0_i32, %c0_i32_0 : i32, i32
  }
  func.func @transform_4(%arg0: i32) -> (i32, i32) {
    %c0_i32 = arith.constant 0 : i32
    %c0_i32_0 = arith.constant 0 : i32
    %c0_i32_1 = arith.constant 0 : i32
    return %c0_i32, %c0_i32_0 : i32, i32
  }
  func.func @transform_5(%arg0: i32) -> (i32, i32) {
    %c0_i32 = arith.constant 0 : i32
    %c0_i32_0 = arith.constant 0 : i32
    %c0_i32_1 = arith.constant 0 : i32
    return %c0_i32, %c0_i32_0 : i32, i32
  }
  func.func @transform_6(%arg0: i32) -> (i32, i32) {
    %c0_i32 = arith.constant 0 : i32
    %c0_i32_0 = arith.constant 0 : i32
    %c0_i32_1 = arith.constant 0 : i32
    return %c0_i32, %c0_i32_0 : i32, i32
  }
  func.func @transform_7(%arg0: i32) -> (i32, i32) {
    %c0_i32 = arith.constant 0 : i32
    %c0_i32_0 = arith.constant 0 : i32
    return %arg0, %c0_i32 : i32, i32
  }
}

</mosaic_0001>

<bundles_post_ra>
// kernel: tpu_custom_call.1
= control target key start
LH: loop header
LB: loop body
LE: loop exit
PB: predicated region body
PF: predicated region fallthrough
CT: control target
= control target key end

     0   :  { %12 = vsyncpa [#allocation3], 0  ;;  %s1290_s0 = inlined_call_operand.vmem [shape: f32[8,784], index: 0, kind: input, shape index: {}]   ;;  %s1291_s1 = inlined_call_operand.hbm [shape: bf16[784,128], index: 1, kind: input, shape index: {}]   ;;  %s1292_s2 = inlined_call_operand.vmem [shape: f32[1,128], index: 2, kind: input, shape index: {}]   ;;  %s1293_s3 = inlined_call_operand.vmem [shape: bf16[128,64], index: 3, kind: input, shape index: {}]   ;;  %s1294_s4 = inlined_call_operand.vmem [shape: f32[1,64], index: 4, kind: input, shape index: {}]   ;;  %s1295_s5 = inlined_call_operand.vmem [shape: bf16[64,128], index: 5, kind: input, shape index: {}]   ;;  %s1296_s6 = inlined_call_operand.vmem [shape: f32[1,128], index: 6, kind: input, shape index: {}]   ;;  %s1297_s7 = inlined_call_operand.hbm [shape: bf16[8,128], index: 7, kind: output, shape index: {}]  }
   0x1   :  { %13 = vsyncpa [#allocation4], 0  ;;  %s1135_s24 = smov [#allocation2]   ;;  %s1087_s28 = scalar_lea.hbm %s1291_s1, 6272 }
   0x2   :  { %s21_s25 = sshll.u32 %s1135_s24, 4  ;;  %p1088_p0 = scmp.ne.s32.totalorder %s1291_s1, %s1087_s28  ;;  %s22_s25 = int_to_ptr.vmem [resolvable:$true] %s21_s25 }
   0x3   :  { %p1091_p1 = scmp.lt.u32.totalorder %s1087_s28, %s1291_s1 }
   0x5   :  { %p1093_p2 = pnand %p1091_p1, %p1088_p0 }
   0x7   :  { %1096 = shalt.err (!%p1093_p2)
}
   0x8   :  { %s1097_s10 = scalar_lea.vmem %s22_s25, 6272  ;;  %p1102_p4 = scmp.lt.s32.totalorder %s22_s25, %s22_s25 }
   0x9   :  { %p1098_p3 = scmp.ne.s32.totalorder %s22_s25, %s1097_s10  ;;  %p1103_p5 = scmp.lt.s32.totalorder %s1097_s10, %s1097_s10 }
   0xb   :  { %p1104_p6 = por %p1103_p5, %p1102_p4 }
   0xd   :  { %p1105_p7 = pnand %p1104_p6, %p1098_p3 }
   0xf   :  { %1108 = shalt.err (!%p1105_p7)
}
  0x10   :  { %s1136_s11 = smov 64   ;;  %s1137_s12 = smov 4  }
  0x11   :  { %27 = dma.hbm_to_vmem [thread:$0]  %s1291_s1, 6272, %s22_s25, [#allocation3], %s1136_s11, %s1136_s11, %s1137_s12  }
  0x12   :  { %1131 = dma.done.wait [#allocation3], 6272  }
  0x13   :  { %1132 = vsyncadd [#allocation3], 4294961024  ;;  %v1026_v0 = vld [vmem:[#allocation2 + $0x40] sm:$0xff]   ;;  %v1030_v4 = vld [vmem:[#allocation2 + $0x48] sm:$0xff]   ;;  %v1138_v44 = vmov 0.0   ;;  %vm1139_vm0 = vmmov 0  }
  0x14   :  { %v1027_v1 = vld [vmem:[#allocation2] sm:$0xff]   ;;  %900 = vmatprep.subr.bf16.mxu0 %v1026_v0  ;;  %v1031_v5 = vld [vmem:[#allocation2 + $0x8] sm:$0xff]   ;;  %v1034_v8 = vld [vmem:[#allocation2 + $0x50] sm:$0xff]   ;;  %vm455_vm1 = vcmask 130048   ;;  %vm773_vm2 = vcmask 523264  }
  0x15   :  { %v1028_v2 = vld [vmem:[#allocation2 + $0xc0] sm:$0xff]   ;;  %901 = vmatpush3.bf16.msra.mxu0 %v1027_v1  ;;  %v1032_v6 = vld [vmem:[#allocation2 + $0xc8] sm:$0xff]   ;;  %v1035_v9 = vld [vmem:[#allocation2 + $0x10] sm:$0xff]  }
  0x16   :  { %v1029_v3 = vld [vmem:[#allocation2 + $0x80] sm:$0xff]   ;;  %922 = vmatprep.subr.bf16.mxu1 %v1028_v2  ;;  %902 = vmatprep.subr.bf16.mxu0 %v1030_v4  ;;  %v1033_v7 = vld [vmem:[#allocation2 + $0x88] sm:$0xff]   ;;  %v1036_v10 = vld [vmem:[#allocation2 + $0xd0] sm:$0xff]  }
  0x17   :  { %923 = vmatpush3.bf16.msra.mxu1 %v1029_v3  ;;  %v1037_v11 = vld [vmem:[#allocation2 + $0x90] sm:$0xff]   ;;  %v1038_v12 = vld [vmem:[#allocation2 + $0x58] sm:$0xff]   ;;  %v1042_v16 = vld [vmem:[#allocation2 + $0x60] sm:$0xff]  }
  0x18   :  { %924 = vmatprep.subr.bf16.mxu1 %v1032_v6  ;;  %v1039_v13 = vld [vmem:[#allocation2 + $0x18] sm:$0xff]   ;;  %v1043_v17 = vld [vmem:[#allocation2 + $0x20] sm:$0xff]   ;;  %v1046_v20 = vld [vmem:[#allocation2 + $0x68] sm:$0xff]  }
  0x19   :  { %903 = vmatpush3.bf16.msra.mxu0 %v1031_v5  ;;  %v1040_v14 = vld [vmem:[#allocation2 + $0xd8] sm:$0xff]   ;;  %v1044_v18 = vld [vmem:[#allocation2 + $0xe0] sm:$0xff]   ;;  %v1047_v21 = vld [vmem:[#allocation2 + $0x28] sm:$0xff]  }
  0x1a   :  { %904 = vmatprep.subr.bf16.mxu0 %v1034_v8  ;;  %v1041_v15 = vld [vmem:[#allocation2 + $0x98] sm:$0xff]   ;;  %v1045_v19 = vld [vmem:[#allocation2 + $0xa0] sm:$0xff]   ;;  %v1048_v22 = vld [vmem:[#allocation2 + $0xe8] sm:$0xff]  }
  0x1b   :  { %925 = vmatpush3.bf16.msra.mxu1 %v1033_v7  ;;  %v1049_v23 = vld [vmem:[#allocation2 + $0xa8] sm:$0xff]   ;;  %v1050_v24 = vld [vmem:[#allocation2 + $0x70] sm:$0xff]   ;;  %v1054_v28 = vld [vmem:[#allocation2 + $0x78] sm:$0xff]  }
  0x1c   :  { %926 = vmatprep.subr.bf16.mxu1 %v1036_v10  ;;  %v1051_v25 = vld [vmem:[#allocation2 + $0x30] sm:$0xff]   ;;  %v1055_v29 = vld [vmem:[#allocation2 + $0x38] sm:$0xff]   ;;  %v43_v31 = vld [vmem:[%s1290_s0 + $0x8] sm:$0xff] }
  0x1d   :  { %905 = vmatpush3.bf16.msra.mxu0 %v1035_v9  ;;  %v1052_v26 = vld [vmem:[#allocation2 + $0xf0] sm:$0xff]   ;;  %v1056_v30 = vld [vmem:[#allocation2 + $0xf8] sm:$0xff]   ;;  %v50_v32 = vpack.c.bf16 %v43_v31, %v43_v31  ;;  %v42_v34 = vld [vmem:[%s1290_s0] sm:$0xff] }
  0x1e   :  { %906 = vmatprep.subr.bf16.mxu0 %v1038_v12  ;;  %v1053_v27 = vld [vmem:[#allocation2 + $0xb0] sm:$0xff]   ;;  %v1057_v33 = vld [vmem:[#allocation2 + $0xb8] sm:$0xff]   ;;  %v49_v35 = vpack.c.bf16 %v42_v34, %v42_v34  ;;  %v1058_v36 = vld [vmem:[#allocation2 + $0x140] sm:$0xff]  }
  0x1f   :  { %927 = vmatpush3.bf16.msra.mxu1 %v1037_v11  ;;  %v45_v37 = vld [vmem:[%s1290_s0 + $0x18] sm:$0xff]  ;;  %491 = vmatprep.mubr.bf16.mxu0 %v50_v32  ;;  %v1059_v39 = vld [vmem:[#allocation2 + $0x100] sm:$0xff]   ;;  %v44_v40 = vld [vmem:[%s1290_s0 + $0x10] sm:$0xff] }
  0x20   :  { %928 = vmatprep.subr.bf16.mxu1 %v1040_v14  ;;  %v52_v38 = vpack.c.bf16 %v45_v37, %v45_v37  ;;  %v51_v41 = vpack.c.bf16 %v44_v40, %v44_v40  ;;  %v1060_v42 = vld [vmem:[#allocation2 + $0x148] sm:$0xff]   ;;  %v1062_v45 = vld [vmem:[#allocation2 + $0x150] sm:$0xff]   ;;  %v1064_v47 = vld [vmem:[#allocation2 + $0x158] sm:$0xff]  }
  0x21   :  { %907 = vmatpush3.bf16.msra.mxu0 %v1039_v13  ;;  %v1061_v43 = vld [vmem:[#allocation2 + $0x108] sm:$0xff]   ;;  %v1063_v46 = vld [vmem:[#allocation2 + $0x110] sm:$0xff]   ;;  %v1065_v48 = vld [vmem:[#allocation2 + $0x118] sm:$0xff]  }
  0x22   :  { %908 = vmatprep.subr.bf16.mxu0 %v1042_v16  ;;  %531 = vmatprep.mubr.bf16.mxu1 %v52_v38  ;;  %v1066_v49 = vld [vmem:[#allocation2 + $0x160] sm:$0xff]   ;;  %v1068_v51 = vld [vmem:[#allocation2 + $0x168] sm:$0xff]   ;;  %v1070_v55 = vld [vmem:[#allocation2 + $0x170] sm:$0xff]  }
  0x23   :  { %929 = vmatpush3.bf16.msra.mxu1 %v1041_v15  ;;  %v1067_v50 = vld [vmem:[#allocation2 + $0x120] sm:$0xff]   ;;  %v1069_v52 = vld [vmem:[#allocation2 + $0x128] sm:$0xff]   ;;  %v48_v57 = vld [vmem:[%s1290_s0 + $0x30] sm:$0xff] }
  0x24   :  { %930 = vmatprep.subr.bf16.mxu1 %v1044_v18  ;;  %v1074_v53 = vld [vmem:[#allocation2 + $0x180] sm:$0xff]   ;;  %v47_v54 = vld [vmem:[%s1290_s0 + $0x28] sm:$0xff]  ;;  %v55_v58 = vpack.c.bf16 %v48_v57, %v48_v57  ;;  %v1071_v59 = vld [vmem:[#allocation2 + $0x130] sm:$0xff]  }
  0x25   :  { %909 = vmatpush3.bf16.msra.mxu0 %v1043_v17  ;;  %v54_v56 = vpack.c.bf16 %v47_v54, %v47_v54  ;;  %v1072_v60 = vld [vmem:[#allocation2 + $0x178] sm:$0xff]   ;;  %v46_v62 = vld [vmem:[%s1290_s0 + $0x20] sm:$0xff]  ;;  %v1076_v1 = vld [vmem:[%s1293_s3 + $0x8] sm:$0xff]  }
  0x26   :  { %910 = vmatprep.subr.bf16.mxu0 %v1046_v20  ;;  %v1073_v61 = vld [vmem:[#allocation2 + $0x138] sm:$0xff]   ;;  %v53_v63 = vpack.c.bf16 %v46_v62, %v46_v62  ;;  %v1075_v0 = vld [vmem:[%s1293_s3] sm:$0xff]   ;;  %v1077_v2 = vld [vmem:[%s1293_s3 + $0x10] sm:$0xff]  }
  0x27   :  { %931 = vmatpush3.bf16.msra.mxu1 %v1045_v19  ;;  %v1078_v3 = vld [vmem:[%s1293_s3 + $0x18] sm:$0xff]   ;;  %v1079_v4 = vld [vmem:[%s1293_s3 + $0x20] sm:$0xff]   ;;  %v1080_v5 = vld [vmem:[%s1293_s3 + $0x28] sm:$0xff]  }
  0x28   :  { %932 = vmatprep.subr.bf16.mxu1 %v1048_v22  ;;  %v1081_v6 = vld [vmem:[%s1293_s3 + $0x30] sm:$0xff]   ;;  %v1082_v7 = vld [vmem:[%s1293_s3 + $0x38] sm:$0xff]   ;;  %v1083_v8 = vld [vmem:[%s1295_s5] sm:$0xff]  }
  0x29   :  { %911 = vmatpush3.bf16.msra.mxu0 %v1047_v21  ;;  %v1084_v9 = vld [vmem:[%s1295_s5 + $0x8] sm:$0xff]   ;;  %v834_v11 = vld [vmem:[%s1292_s2] ss:$0 sm:$0xff]  ;;  %v1086_v37 = vld [vmem:[%s1295_s5 + $0x18] sm:$0xff]  }
  0x2a   :  { %912 = vmatprep.subr.bf16.mxu0 %v1050_v24  ;;  %v885_v38 = vld [vmem:[%s1294_s4] ss:$0 sm:$0xff] }
  0x2b   :  { %933 = vmatpush3.bf16.msra.mxu1 %v1049_v23 }
  0x2c   :  { %934 = vmatprep.subr.bf16.mxu1 %v1052_v26 }
  0x2d   :  { %913 = vmatpush3.bf16.msra.mxu0 %v1051_v25 }
  0x2e   :  { %914 = vmatprep.subr.bf16.mxu0 %v1054_v28 }
  0x2f   :  { %935 = vmatpush3.bf16.msra.mxu1 %v1053_v27 }
  0x30   :  { %936 = vmatprep.subr.bf16.mxu1 %v1056_v30 }
  0x31   :  { %915 = vmatpush3.bf16.msra.mxu0 %v1055_v29 }
  0x32   :  { %944 = vmatprep.subr.bf16.mxu0 %v1058_v36  ;;  %v1085_v36 = vld [vmem:[%s1295_s5 + $0x10] sm:$0xff]   ;;  %s1140_s5 = smov [#allocation5]  }
  0x33   :  { %937 = vmatpush3.bf16.msra.mxu1 %v1057_v33  ;;  %s825_s8 = sshll.u32 %s1140_s5, 4  ;;  %s826_s8 = int_to_ptr.vmem [resolvable:$true] %s825_s8 }
  0x34   :  { %492 = vmatmul.mubr.bf16.vlgmr.msra.gmra.mrb[0].mxu0 %v49_v35  ;;  %982 = vmatprep.subr.bf16.mxu1 %v1138_v44  ;;  %s1109_s4 = scalar_lea.vmem %s826_s8, 64  ;;  %p1114_p9 = scmp.lt.s32.totalorder %s826_s8, %s826_s8 }
  0x35   :  { %945 = vmatpush3.bf16.msra.mxu0 %v1059_v39  ;;  %571 = vmatprep.mubr.bf16.mxu0 %v54_v56  ;;  %p1110_p8 = scmp.ne.s32.totalorder %s826_s8, %s1109_s4  ;;  %p1115_p10 = scmp.lt.s32.totalorder %s1109_s4, %s1109_s4 }
  0x36   :  { %532 = vmatmul.mubr.bf16.vlgmr.msra.gmra.mrb[0].mxu1 %v51_v41  ;;  %946 = vmatprep.subr.bf16.mxu0 %v1060_v42 }
  0x37   :  { %984 = vmatprep.mubr.msk.bf16.mxu1 %vm1139_vm0, %v1138_v44  ;;  %983 = vmatpush3.bf16.msra.mxu1 %v1074_v53  ;;  %p1116_p11 = por %p1115_p10, %p1114_p9 }
  0x38   :  { %988 = vmatprep.subr.bf16.mxu1 %v1138_v44 }
  0x39   :  { %947 = vmatpush3.bf16.msra.mxu0 %v1061_v43  ;;  %p1117_p12 = pnand %p1116_p11, %p1110_p8 }
  0x3a   :  { %948 = vmatprep.subr.bf16.mxu0 %v1062_v45 }
  0x3d   :  { %949 = vmatpush3.bf16.msra.mxu0 %v1063_v46 }
  0x3e   :  { %950 = vmatprep.subr.bf16.mxu0 %v1064_v47  ;;  %985 = vmatmul.mubr.msk.bf16.vlgmr.msra.gmra.mrb[4].mxu1 %vm455_vm1, %v55_v58 }
  0x3f   :  { %1004 = vmatprep.mubr.msk.bf16.mxu1 %vm1139_vm0, %v1138_v44  ;;  %989 = vmatpush3.bf16.msra.mxu1 %v1075_v0 }
  0x40   :  { %990 = vmatprep.subr.bf16.mxu1 %v1138_v44 }
  0x41   :  { %951 = vmatpush3.bf16.msra.mxu0 %v1065_v48 }
  0x42   :  { %952 = vmatprep.subr.bf16.mxu0 %v1066_v49 }
  0x43   :  { %991 = vmatpush3.bf16.msra.mxu1 %v1076_v1 }
  0x44   :  { %992 = vmatprep.subr.bf16.mxu1 %v1138_v44 }
  0x45   :  { %953 = vmatpush3.bf16.msra.mxu0 %v1067_v50 }
  0x46   :  { %954 = vmatprep.subr.bf16.mxu0 %v1068_v51 }
  0x47   :  { %993 = vmatpush3.bf16.msra.mxu1 %v1077_v2 }
  0x48   :  { %994 = vmatprep.subr.bf16.mxu1 %v1138_v44 }
  0x49   :  { %955 = vmatpush3.bf16.msra.mxu0 %v1069_v52 }
  0x4a   :  { %956 = vmatprep.subr.bf16.mxu0 %v1070_v55 }
  0x4b   :  { %995 = vmatpush3.bf16.msra.mxu1 %v1078_v3 }
  0x4c   :  { %996 = vmatprep.subr.bf16.mxu1 %v1138_v44 }
  0x4d   :  { %957 = vmatpush3.bf16.msra.mxu0 %v1071_v59 }
  0x4e   :  { %958 = vmatprep.subr.bf16.mxu0 %v1072_v60 }
  0x4f   :  { %997 = vmatpush3.bf16.msra.mxu1 %v1079_v4 }
  0x50   :  { %998 = vmatprep.subr.bf16.mxu1 %v1138_v44 }
  0x51   :  { %959 = vmatpush3.bf16.msra.mxu0 %v1073_v61 }
  0x52   :  { %1008 = vmatprep.subr.bf16.mxu0 %v1138_v44 }
  0x53   :  { %999 = vmatpush3.bf16.msra.mxu1 %v1080_v5 }
  0x54   :  { %572 = vmatmul.mubr.bf16.vlgmr.msra.gmra.mrb[4].mxu0 %v53_v63  ;;  %1000 = vmatprep.subr.bf16.mxu1 %v1138_v44 }
  0x55   :  { %1016 = vmatprep.mubr.msk.bf16.mxu0 %vm1139_vm0, %v1138_v44  ;;  %1009 = vmatpush3.bf16.msra.mxu0 %v1083_v8 }
  0x56   :  { %1010 = vmatprep.subr.bf16.mxu0 %v1138_v44 }
  0x57   :  { %1001 = vmatpush3.bf16.msra.mxu1 %v1081_v6 }
  0x58   :  { %1002 = vmatprep.subr.bf16.mxu1 %v1138_v44 }
  0x59   :  { %1011 = vmatpush3.bf16.msra.mxu0 %v1084_v9 }
  0x5a   :  { %1012 = vmatprep.subr.bf16.mxu0 %v1138_v44 }
  0x5b   :  { %1003 = vmatpush3.bf16.msra.mxu1 %v1082_v7 }
  0x5d   :  { %1013 = vmatpush3.bf16.msra.mxu0 %v1085_v36 }
  0x5e   :  { %1014 = vmatprep.subr.bf16.mxu0 %v1138_v44  ;;  %v894_v44 = vld [vmem:[%s1296_s6] ss:$0 sm:$0xff] }
  0x61   :  { %1015 = vmatpush3.bf16.msra.mxu0 %v1086_v37 }
 0x107   :  { %v916_v10 = vpop.f32.mrb[0].mxu0 }
 0x108   :  { %v917_v12 = vpop.f32.mrb[1].mxu0 }
 0x109   :  { %v918_v13 = vadd.f32 %v917_v12, %v916_v10  ;;  %v919_v14 = vpop.f32.mrb[2].mxu0  ;;  %v938_v15 = vpop.f32.mrb[0].mxu1 }
 0x10a   :  { %v920_v16 = vpop.f32.mrb[3].mxu0  ;;  %v939_v18 = vpop.f32.mrb[1].mxu1 }
 0x10b   :  { %v494_v17 = vadd.f32 %v918_v13, %v834_v11  ;;  %v940_v19 = vadd.f32 %v939_v18, %v938_v15  ;;  %v941_v20 = vpop.f32.mrb[2].mxu1 }
 0x10c   :  { %v942_v21 = vpop.f32.mrb[3].mxu1 }
 0x10d   :  { %v534_v22 = vadd.f32 %v940_v19, %v494_v17 }
 0x111   :  { %v613_v23 = vpop.f32.mrb[4].mxu1 }
 0x112   :  { %v986_v24 = vpop.f32.mrb[5].mxu1 }
 0x113   :  { %v616_v25 = vpop.f32.mrb[6].mxu1 }
 0x114   :  { %v987_v26 = vpop.f32.mrb[7].mxu1 }
 0x127   :  { %v960_v27 = vpop.f32.mrb[4].mxu0 }
 0x128   :  { %v961_v28 = vpop.f32.mrb[5].mxu0 }
 0x129   :  { %v962_v29 = vadd.f32 %v961_v28, %v960_v27  ;;  %v963_v30 = vpop.f32.mrb[6].mxu0 }
 0x12a   :  { %v964_v31 = vpop.f32.mrb[7].mxu0 }
 0x12b   :  { %v574_v32 = vadd.f32 %v962_v29, %v534_v22 }
 0x12d   :  { %v614_v33 = vadd.f32 %v613_v23, %v574_v32 }
 0x12f   :  { %v619_v34 = vmax.f32 %v614_v33, 0.0 }
 0x131   :  { %v620_v35 = vpack.c.bf16 %v619_v34, %v619_v34 }
 0x133   :  { %1005 = vmatmul.mubr.bf16.vlgmr.msra.gmra.mrb[8].mxu1 %v620_v35 }
 0x206   :  { %v726_v39 = vpop.f32.mrb[8].mxu1 }
 0x207   :  { %v727_v40 = vadd.f32 %v885_v38, %v726_v39  ;;  %v1006_v41 = vpop.f32.mrb[9].mxu1 }
 0x208   :  { %v729_v42 = vpop.f32.mrb[10].mxu1 }
 0x209   :  { %v732_v43 = vmax.f32 %v727_v40, 0.0  ;;  %v1007_v45 = vpop.f32.mrb[11].mxu1 }
 0x20b   :  { %v733_v46 = vpack.c.bf16 %v732_v43, %v732_v43 }
 0x20d   :  { %1017 = vmatmul.mubr.msk.bf16.vlgmr.msra.gmra.mrb[8].mxu0 %vm773_vm2, %v733_v46 }
 0x2e0   :  { %v811_v47 = vpop.f32.mrb[8].mxu0 }
 0x2e1   :  { %v812_v48 = vadd.f32 %v894_v44, %v811_v47  ;;  %v1018_v49 = vpop.f32.mrb[9].mxu0 }
 0x2e2   :  { %v814_v50 = vpop.f32.mrb[10].mxu0 }
 0x2e3   :  { %v817_v51 = vpack.c.bf16 %v812_v48, %v812_v48  ;;  %v1019_v52 = vpop.f32.mrb[11].mxu0 }
 0x2e5   :  { %818 = vst [vmem:[#allocation5] sm:$0xf] %v817_v51 }
 0x2e6   :  { %1120 = shalt.err (!%p1117_p12)
}
 0x2e7   :  { %s1121_s6 = scalar_lea.hbm %s1297_s7, 64 }
 0x2e8   :  { %p1122_p13 = scmp.ne.s32.totalorder %s1297_s7, %s1121_s6  ;;  %p1125_p0 = scmp.lt.u32.totalorder %s1121_s6, %s1297_s7 }
 0x2ea   :  { %p1127_p1 = pnand %p1125_p0, %p1122_p13 }
 0x2ec   :  { %1130 = shalt.err (!%p1127_p1)
}
 0x2ed   :  { %828 = dma.vmem_to_hbm [thread:$0]  %s826_s8, 64, %s1297_s7, [#allocation4]  }
 0x2ee   :  { %1133 = dma.done.wait [#allocation4], 64  }
 0x2ef   :  { %1134 = vsyncadd [#allocation4], 4294967232 }
 0x2f0   :  { %832 = vsyncpa [#allocation3], 1 }
 0x2f1   :  { %833 = vsyncpa [#allocation4], 1 }

</bundles_post_ra>
